<compile_context>
chip_gen: v7x
topology: tpu7x:2x2x1
jax: 0.10.0
libtpu: 0.0.40
codegen_flags: <defaults>
</compile_context>

<pallas_src>
import math

import jax
import jax.numpy as jnp
import numpy as np
from jax import lax
from jax.experimental import pallas as pl
from jax.experimental.pallas import tpu as pltpu

# ----- model hyper-parameters (small, consistent with the module) -----
BATCH = 2
MAX_LEN = 8
EMBED = 32
HEADS = 2                       # kernel layout assumes EMBED // HEAD_DIM == HEADS == 2
HEAD_DIM = EMBED // HEADS
LN_EPS = 1e-5
NEG_BIG = -1e10                 # torch masked_fill value (-10000000000.0)
CROSS_BIG = -2e10               # isolates different (batch, head) groups in the packed softmax
OUT_PAD = 128                   # lane-dense output width
R16 = BATCH * MAX_LEN           # 16 rows
XW = ((2 * (EMBED + 1) + 7) // 8) * 8   # 72: width of the block-diag [x | 1] projection slab


def _erf_f32(x):
    # Abramowitz & Stegun 7.1.26 rational approximation (|err| ~1.5e-7).
    a1, a2, a3, a4, a5 = 0.254829592, -0.284496736, 1.421413741, -1.453152027, 1.061405429
    p = 0.3275911
    sign = jnp.where(x < 0.0, -1.0, 1.0)
    ax = jnp.abs(x)
    t = 1.0 / (1.0 + p * ax)
    poly = ((((a5 * t + a4) * t + a3) * t + a2) * t + a1) * t
    return sign * (1.0 - poly * jnp.exp(-ax * ax))


def _gelu_exact(x):
    return 0.5 * x * (1.0 + _erf_f32(x * (1.0 / math.sqrt(2.0))))


def _layernorm(x, gamma, beta):
    mu = jnp.mean(x, axis=-1, keepdims=True)
    xc = x - mu
    var = jnp.mean(xc * xc, axis=-1, keepdims=True)
    inv = lax.rsqrt(var + LN_EPS)
    return xc * inv * gamma + beta


def transformer_block_kernel(x2_ref, xaux_ref, wproj_ref, wmisc_ref, o_ref):
    f32 = jnp.float32
    E, D, R = EMBED, HEAD_DIM, R16
    half = R // 2

    x2 = x2_ref[...]                                   # (2R, XW) block-diag [x | 1] slab
    x_r = xaux_ref[pl.ds(0, R), :]                     # (R, E)   residual rows (output order)
    keep = xaux_ref[pl.ds(R, 2 * R), :]                # (2R, 2R) 1 = same (b,h) & key unmasked
    bias = xaux_ref[pl.ds(3 * R, 2 * R), :]            # (2R, 2R) 0 / -1e10 / -2e10

    # ---- fused per-row-half Q/K/V projections (bias folded in via ones column): 3 MXU pushes ----
    q = jnp.dot(x2, wproj_ref[pl.ds(0, XW), :], preferred_element_type=f32)       # (2R, D)
    k = jnp.dot(x2, wproj_ref[pl.ds(XW, XW), :], preferred_element_type=f32)      # (2R, D)
    v = jnp.dot(x2, wproj_ref[pl.ds(2 * XW, XW), :], preferred_element_type=f32)  # (2R, D)

    # ---- all (batch, head) groups at once: one score matmul + one PV matmul ----
    s = lax.dot_general(q, k, (((1,), (1,)), ((), ())), preferred_element_type=f32)  # (2R, 2R)
    s = s * (1.0 / math.sqrt(D))
    s = s * keep + bias                                # masked_fill + cross-group isolation
    m = jnp.max(s, axis=-1, keepdims=True)
    e = jnp.exp(s - m)
    p = e / jnp.sum(e, axis=-1, keepdims=True)         # exact divide (tolerance margin is free)
    o = jnp.dot(p, v, preferred_element_type=f32)      # (2R, D)

    wo = wmisc_ref[pl.ds(0, E), :]                     # (E, E)
    wfc = wmisc_ref[pl.ds(E, E), :]                    # (E, E)
    pr = wmisc_ref[pl.ds(2 * E, 8), :]                 # (8, E) packed row params
    bo, bfc = pr[0:1, :], pr[1:2, :]
    g1, be1 = pr[2:3, :], pr[3:4, :]
    g2, be2 = pr[4:5, :], pr[5:6, :]
    alpha = pr[6:7, :]                                 # alpha broadcast across the row

    # ---- head recombination + output projection: tile-aligned row slices, two MXU pushes ----
    o_h0 = jnp.concatenate([o[0:half, :], o[R:R + half, :]], axis=0)          # (R, D)
    o_h1 = jnp.concatenate([o[half:R, :], o[R + half:2 * R, :]], axis=0)      # (R, D)
    att = (jnp.dot(o_h0, wo[0:D, :], preferred_element_type=f32)
           + jnp.dot(o_h1, wo[D:E, :], preferred_element_type=f32) + bo)

    # ---- AddNorm1 -> FC/GELU -> AddNorm2 -> alpha mix (nn.Dropout is identity at inference) ----
    s1 = _layernorm(x_r + att, g1, be1)
    f = jnp.dot(s1, wfc, preferred_element_type=f32) + bfc
    f = _gelu_exact(f)
    s2 = _layernorm(s1 + f, g2, be2)
    out = x_r * alpha + s2 * (1.0 - alpha)

    # lane-dense (unmasked) 128-wide store; wrapper slices [:, :E]
    o_ref[...] = jnp.concatenate([out, jnp.zeros((R, OUT_PAD - E), f32)], axis=1)


def transformer_block_forward(x, mask, params):
    B, L, E = x.shape
    H, D = HEADS, HEAD_DIM
    f32 = jnp.float32
    x = x.astype(f32)
    R = B * L
    npq = L // H                       # natural rows per head block (4)

    # --- static index plumbing for the quirky reshape(B, H, L, D) head split ---
    idx = np.arange(R)
    # rows feeding the Q/K/V projections: i = h*(B*npq) + b*npq + j  <->  natural (b, l = h*npq + j)
    ord_b = (idx % (B * npq)) // npq
    ord_l = npq * (idx // (B * npq)) + (idx % npq)
    # residual / output row order: r <-> (b, quirky position p)
    res_b = (idx % (B * npq)) // npq
    res_p = H * (idx % npq) + (idx // (B * npq))
    x_ord = x[ord_b, ord_l]            # (R, E)
    x_res = x[res_b, res_p]            # (R, E)

    # --- per-(query,key) group compatibility + additive mask bias (precomputed, no in-kernel cmp) ---
    rho = np.arange(2 * R)
    g_h = (rho % R) // (B * npq)
    g_b = (rho % (B * npq)) // npq
    g_m = H * (rho % npq) + rho // R                   # quirky key position
    same = (g_h[:, None] == g_h[None, :]) & (g_b[:, None] == g_b[None, :])
    same_j = jnp.asarray(same)
    key_valid = mask[g_b, g_m] != 0                    # torch indexes the mask at the quirky key idx
    keep = jnp.logical_and(same_j, key_valid[None, :])
    keep_f = keep.astype(f32)
    bias_f = jnp.where(keep, 0.0, jnp.where(same_j, NEG_BIG, CROSS_BIG)).astype(f32)

    # --- block-diagonal [x | 1] slab: one matmul applies different W column-halves per row half ---
    ones = jnp.ones((R, 1), f32)
    zc = lambda c: jnp.zeros((R, c), f32)
    pad_tail = XW - 2 * (E + 1)
    x2 = jnp.concatenate([
        jnp.concatenate([x_ord, ones, zc(E + 1), zc(pad_tail)], axis=1),
        jnp.concatenate([zc(E + 1), x_ord, ones, zc(pad_tail)], axis=1),
    ], axis=0)                                         # (2R, XW)

    xaux = jnp.concatenate([x_res, keep_f, bias_f], axis=0)          # (5R, E) = (80, 32)

    def wslab(w, b):                   # torch (out,in) weight + bias -> (XW, D) stacked halves
        wt = w.T.astype(f32)
        bb = b.astype(f32)
        return jnp.concatenate([
            wt[:, 0:D], bb[None, 0:D],
            wt[:, D:E], bb[None, D:E],
            jnp.zeros((pad_tail, D), f32)], axis=0)
    wproj = jnp.concatenate(
        [wslab(params["wq"], params["bq"]),
         wslab(params["wk"], params["bk"]),
         wslab(params["wv"], params["bv"])], axis=0)                 # (3*XW, D) = (216, 16)

    def row(v):
        return v.astype(f32).reshape(1, E)
    wmisc = jnp.concatenate([
        params["wo"].T.astype(f32),                                  # rows 0:E
        params["wfc"].T.astype(f32),                                 # rows E:2E
        row(params["bo"]), row(params["bfc"]),
        row(params["g1"]), row(params["be1"]),
        row(params["g2"]), row(params["be2"]),
        jnp.full((1, E), params["alpha"][0], f32),
        jnp.zeros((1, E), f32),
    ], axis=0)                                                       # (2E + 8, E) = (72, 32)

    vmem = pl.BlockSpec(memory_space=pltpu.MemorySpace.VMEM)
    out_p = pl.pallas_call(
        transformer_block_kernel,
        out_shape=jax.ShapeDtypeStruct((R, OUT_PAD), f32),
        in_specs=[vmem, vmem, vmem, vmem],
        out_specs=vmem,
    )(x2, xaux, wproj, wmisc)

    # un-permute rows back to natural (b, l) order and drop the lane padding
    inv = np.array([B * npq * (p % H) + npq * b + p // H for b in range(B) for p in range(L)])
    return out_p[inv, 0:E].reshape(B, L, E)


def reference_forward(x, mask, params):
    """Pure-JAX reproduction of the PyTorch forward (eval mode)."""
    B, L, E = x.shape
    H, D = HEADS, E // HEADS
    lin = lambda t, w, bb: t @ w.T + bb
    q = lin(x, params["wq"], params["bq"])
    k = lin(x, params["wk"], params["bk"])
    v = lin(x, params["wv"], params["bv"])
    # quirky head split: reshape(B, H, L, D) directly (matches torch .reshape semantics)
    qh = q.reshape(B, H, L, D)
    kh = k.reshape(B, H, L, D)
    vh = v.reshape(B, H, L, D)
    scores = jnp.einsum("bhld,bhmd->bhlm", qh, kh) / math.sqrt(D)
    m = mask[:, None, None, :]
    scores = jnp.where(m == 0, NEG_BIG, scores)
    probs = jax.nn.softmax(scores, axis=-1)
    att = jnp.einsum("bhlm,bhmd->bhld", probs, vh)
    att = att.transpose(0, 2, 1, 3).reshape(B, L, E)
    att = lin(att, params["wo"], params["bo"])

    def ln(t, g, bb):
        mu = t.mean(-1, keepdims=True)
        var = ((t - mu) ** 2).mean(-1, keepdims=True)
        return (t - mu) / jnp.sqrt(var + LN_EPS) * g + bb

    s1 = ln(x + att, params["g1"], params["be1"])
    f = lin(s1, params["wfc"], params["bfc"])
    f = 0.5 * f * (1.0 + jax.scipy.special.erf(f / math.sqrt(2.0)))
    s2 = ln(s1 + f, params["g2"], params["be2"])
    a = params["alpha"][0]
    return x * a + s2 * (1.0 - a)


if __name__ == "__main__":
    key = jax.random.PRNGKey(0)
    keys = jax.random.split(key, 12)
    E = EMBED

    def w(k):
        return jax.random.normal(k, (E, E), jnp.float32) * 0.1  # torch-style (out, in)

    def b(k):
        return jax.random.normal(k, (E,), jnp.float32) * 0.1

    params = {
        "wq": w(keys[0]), "bq": b(keys[1]),
        "wk": w(keys[2]), "bk": b(keys[3]),
        "wv": w(keys[4]), "bv": b(keys[5]),
        "wo": w(keys[6]), "bo": b(keys[7]),
        "wfc": w(keys[8]), "bfc": b(keys[9]),
        "g1": jnp.ones((E,), jnp.float32), "be1": jnp.zeros((E,), jnp.float32),
        "g2": jnp.ones((E,), jnp.float32), "be2": jnp.zeros((E,), jnp.float32),
        "alpha": jnp.array([0.5], jnp.float32),  # nn.Parameter(torch.tensor(0.5))
    }
    # TODO(synk): nn.Dropout layers are treated as identity (inference mode).

    x = jax.random.normal(keys[10], (BATCH, MAX_LEN, E), jnp.float32)
    mask = jnp.array(
        [[1] * MAX_LEN, [1] * (MAX_LEN - 2) + [0, 0]], dtype=jnp.int32
    )  # (B, L) padding mask

    out = transformer_block_forward(x, mask, params)
    out = jax.block_until_ready(out)

    ref = reference_forward(x, mask, params)
    assert out.shape == (BATCH, MAX_LEN, E)
    max_err = float(jnp.max(jnp.abs(out - ref)))
    assert max_err < 1e-3, f"max abs error too large: {max_err}"
    print("KERNEL_OK")
</pallas_src>

<mosaic_0001>
module attributes {stable_mosaic.version = 11 : i64} {
  func.func @transformer_block_kernel(%arg0: memref<32x72xf32, #tpu.memory_space<vmem>>, %arg1: memref<80x32xf32, #tpu.memory_space<vmem>>, %arg2: memref<216x16xf32, #tpu.memory_space<vmem>>, %arg3: memref<72x32xf32, #tpu.memory_space<vmem>>, %arg4: memref<16x128xf32, #tpu.memory_space<vmem>>) attributes {dimension_semantics = [], scalar_prefetch = 0 : i64, scratch_operands = 0 : i64, tpu.core_type = #tpu.core_type<tc>} {
    %c0 = arith.constant 0 : index
    %c0_0 = arith.constant 0 : index
    %0 = vector.load %arg0[%c0, %c0_0] : memref<32x72xf32, #tpu.memory_space<vmem>>, vector<32x72xf32>
    %c0_1 = arith.constant 0 : index
    %c0_2 = arith.constant 0 : index
    %1 = vector.load %arg1[%c0_1, %c0_2] : memref<80x32xf32, #tpu.memory_space<vmem>>, vector<16x32xf32>
    %c16 = arith.constant 16 : index
    %c0_3 = arith.constant 0 : index
    %2 = vector.load %arg1[%c16, %c0_3] : memref<80x32xf32, #tpu.memory_space<vmem>>, vector<32x32xf32>
    %c48 = arith.constant 48 : index
    %c0_4 = arith.constant 0 : index
    %3 = vector.load %arg1[%c48, %c0_4] : memref<80x32xf32, #tpu.memory_space<vmem>>, vector<32x32xf32>
    %c0_5 = arith.constant 0 : index
    %c0_6 = arith.constant 0 : index
    %4 = vector.load %arg2[%c0_5, %c0_6] : memref<216x16xf32, #tpu.memory_space<vmem>>, vector<72x16xf32>
    %cst = arith.constant dense<0.000000e+00> : vector<32x16xf32>
    %5 = tpu.matmul %0, %4, %cst {dimension_numbers = #tpu.dot_dimension_numbers<[1], [0], [0], [1], [0, 0, 1, 1], [], []>} : vector<32x72xf32>, vector<72x16xf32>, vector<32x16xf32> -> vector<32x16xf32>
    %c72 = arith.constant 72 : index
    %c0_7 = arith.constant 0 : index
    %6 = vector.load %arg2[%c72, %c0_7] : memref<216x16xf32, #tpu.memory_space<vmem>>, vector<72x16xf32>
    %cst_8 = arith.constant dense<0.000000e+00> : vector<32x16xf32>
    %7 = tpu.matmul %0, %6, %cst_8 {dimension_numbers = #tpu.dot_dimension_numbers<[1], [0], [0], [1], [0, 0, 1, 1], [], []>} : vector<32x72xf32>, vector<72x16xf32>, vector<32x16xf32> -> vector<32x16xf32>
    %c144 = arith.constant 144 : index
    %c0_9 = arith.constant 0 : index
    %8 = vector.load %arg2[%c144, %c0_9] : memref<216x16xf32, #tpu.memory_space<vmem>>, vector<72x16xf32>
    %cst_10 = arith.constant dense<0.000000e+00> : vector<32x16xf32>
    %9 = tpu.matmul %0, %8, %cst_10 {dimension_numbers = #tpu.dot_dimension_numbers<[1], [0], [0], [1], [0, 0, 1, 1], [], []>} : vector<32x72xf32>, vector<72x16xf32>, vector<32x16xf32> -> vector<32x16xf32>
    %cst_11 = arith.constant dense<0.000000e+00> : vector<32x32xf32>
    %10 = tpu.matmul %5, %7, %cst_11 {dimension_numbers = #tpu.dot_dimension_numbers<[1], [1], [0], [0], [0, 0, 1, 0], [], []>} : vector<32x16xf32>, vector<32x16xf32>, vector<32x32xf32> -> vector<32x32xf32>
    %cst_12 = arith.constant 2.500000e-01 : f32
    %11 = vector.broadcast %cst_12 : f32 to vector<32x32xf32>
    %12 = arith.mulf %10, %11 : vector<32x32xf32>
    %13 = arith.mulf %12, %2 : vector<32x32xf32>
    %14 = arith.addf %13, %3 : vector<32x32xf32>
    %cst_13 = arith.constant dense<0xFF800000> : vector<32xf32>
    %15 = vector.multi_reduction <maximumf>, %14, %cst_13 [1] : vector<32x32xf32> to vector<32xf32>
    %16 = vector.shape_cast %15 : vector<32xf32> to vector<32x1xf32>
    %17 = vector.broadcast %16 : vector<32x1xf32> to vector<32x32xf32>
    %18 = arith.subf %14, %17 : vector<32x32xf32>
    %19 = math.exp %18 : vector<32x32xf32>
    %cst_14 = arith.constant dense<0.000000e+00> : vector<32xf32>
    %20 = vector.multi_reduction <add>, %19, %cst_14 [1] : vector<32x32xf32> to vector<32xf32>
    %21 = vector.shape_cast %20 : vector<32xf32> to vector<32x1xf32>
    %22 = vector.broadcast %21 : vector<32x1xf32> to vector<32x32xf32>
    %23 = arith.divf %19, %22 : vector<32x32xf32>
    %cst_15 = arith.constant dense<0.000000e+00> : vector<32x16xf32>
    %24 = tpu.matmul %23, %9, %cst_15 {dimension_numbers = #tpu.dot_dimension_numbers<[1], [0], [0], [1], [0, 0, 1, 1], [], []>} : vector<32x32xf32>, vector<32x16xf32>, vector<32x16xf32> -> vector<32x16xf32>
    %c0_16 = arith.constant 0 : index
    %c0_17 = arith.constant 0 : index
    %25 = vector.load %arg3[%c0_16, %c0_17] : memref<72x32xf32, #tpu.memory_space<vmem>>, vector<32x32xf32>
    %c32 = arith.constant 32 : index
    %c0_18 = arith.constant 0 : index
    %26 = vector.load %arg3[%c32, %c0_18] : memref<72x32xf32, #tpu.memory_space<vmem>>, vector<32x32xf32>
    %c64 = arith.constant 64 : index
    %c0_19 = arith.constant 0 : index
    %27 = vector.load %arg3[%c64, %c0_19] : memref<72x32xf32, #tpu.memory_space<vmem>>, vector<8x32xf32>
    %28 = vector.extract_strided_slice %27 {offsets = [0, 0], sizes = [1, 32], strides = [1, 1]} : vector<8x32xf32> to vector<1x32xf32>
    %29 = vector.extract_strided_slice %27 {offsets = [1, 0], sizes = [1, 32], strides = [1, 1]} : vector<8x32xf32> to vector<1x32xf32>
    %30 = vector.extract_strided_slice %27 {offsets = [2, 0], sizes = [1, 32], strides = [1, 1]} : vector<8x32xf32> to vector<1x32xf32>
    %31 = vector.extract_strided_slice %27 {offsets = [3, 0], sizes = [1, 32], strides = [1, 1]} : vector<8x32xf32> to vector<1x32xf32>
    %32 = vector.extract_strided_slice %27 {offsets = [4, 0], sizes = [1, 32], strides = [1, 1]} : vector<8x32xf32> to vector<1x32xf32>
    %33 = vector.extract_strided_slice %27 {offsets = [5, 0], sizes = [1, 32], strides = [1, 1]} : vector<8x32xf32> to vector<1x32xf32>
    %34 = vector.extract_strided_slice %27 {offsets = [6, 0], sizes = [1, 32], strides = [1, 1]} : vector<8x32xf32> to vector<1x32xf32>
    %35 = vector.extract_strided_slice %24 {offsets = [0, 0], sizes = [8, 16], strides = [1, 1]} : vector<32x16xf32> to vector<8x16xf32>
    %36 = vector.extract_strided_slice %24 {offsets = [16, 0], sizes = [8, 16], strides = [1, 1]} : vector<32x16xf32> to vector<8x16xf32>
    %37 = tpu.concatenate %35, %36 in 0 : vector<8x16xf32>, vector<8x16xf32> -> vector<16x16xf32>
    %38 = vector.extract_strided_slice %24 {offsets = [8, 0], sizes = [8, 16], strides = [1, 1]} : vector<32x16xf32> to vector<8x16xf32>
    %39 = vector.extract_strided_slice %24 {offsets = [24, 0], sizes = [8, 16], strides = [1, 1]} : vector<32x16xf32> to vector<8x16xf32>
    %40 = tpu.concatenate %38, %39 in 0 : vector<8x16xf32>, vector<8x16xf32> -> vector<16x16xf32>
    %41 = vector.extract_strided_slice %25 {offsets = [0, 0], sizes = [16, 32], strides = [1, 1]} : vector<32x32xf32> to vector<16x32xf32>
    %cst_20 = arith.constant dense<0.000000e+00> : vector<16x32xf32>
    %42 = tpu.matmul %37, %41, %cst_20 {dimension_numbers = #tpu.dot_dimension_numbers<[1], [0], [0], [1], [0, 0, 1, 1], [], []>} : vector<16x16xf32>, vector<16x32xf32>, vector<16x32xf32> -> vector<16x32xf32>
    %43 = vector.extract_strided_slice %25 {offsets = [16, 0], sizes = [16, 32], strides = [1, 1]} : vector<32x32xf32> to vector<16x32xf32>
    %cst_21 = arith.constant dense<0.000000e+00> : vector<16x32xf32>
    %44 = tpu.matmul %40, %43, %cst_21 {dimension_numbers = #tpu.dot_dimension_numbers<[1], [0], [0], [1], [0, 0, 1, 1], [], []>} : vector<16x16xf32>, vector<16x32xf32>, vector<16x32xf32> -> vector<16x32xf32>
    %45 = arith.addf %42, %44 : vector<16x32xf32>
    %46 = vector.broadcast %28 : vector<1x32xf32> to vector<16x32xf32>
    %47 = arith.addf %45, %46 : vector<16x32xf32>
    %48 = arith.addf %1, %47 : vector<16x32xf32>
    %cst_22 = arith.constant dense<0.000000e+00> : vector<16xf32>
    %49 = vector.multi_reduction <add>, %48, %cst_22 [1] : vector<16x32xf32> to vector<16xf32>
    %50 = vector.shape_cast %49 : vector<16xf32> to vector<16x1xf32>
    %cst_23 = arith.constant 3.200000e+01 : f32
    %51 = vector.broadcast %cst_23 : f32 to vector<16x1xf32>
    %52 = arith.divf %50, %51 : vector<16x1xf32>
    %53 = vector.broadcast %52 : vector<16x1xf32> to vector<16x32xf32>
    %54 = arith.subf %48, %53 : vector<16x32xf32>
    %55 = arith.mulf %54, %54 : vector<16x32xf32>
    %cst_24 = arith.constant dense<0.000000e+00> : vector<16xf32>
    %56 = vector.multi_reduction <add>, %55, %cst_24 [1] : vector<16x32xf32> to vector<16xf32>
    %57 = vector.shape_cast %56 : vector<16xf32> to vector<16x1xf32>
    %cst_25 = arith.constant 3.200000e+01 : f32
    %58 = vector.broadcast %cst_25 : f32 to vector<16x1xf32>
    %59 = arith.divf %57, %58 : vector<16x1xf32>
    %cst_26 = arith.constant 9.99999974E-6 : f32
    %60 = vector.broadcast %cst_26 : f32 to vector<16x1xf32>
    %61 = arith.addf %59, %60 : vector<16x1xf32>
    %62 = math.rsqrt %61 : vector<16x1xf32>
    %63 = vector.broadcast %62 : vector<16x1xf32> to vector<16x32xf32>
    %64 = arith.mulf %54, %63 : vector<16x32xf32>
    %65 = vector.broadcast %30 : vector<1x32xf32> to vector<16x32xf32>
    %66 = arith.mulf %64, %65 : vector<16x32xf32>
    %67 = vector.broadcast %31 : vector<1x32xf32> to vector<16x32xf32>
    %68 = arith.addf %66, %67 : vector<16x32xf32>
    %cst_27 = arith.constant dense<0.000000e+00> : vector<16x32xf32>
    %69 = tpu.matmul %68, %26, %cst_27 {dimension_numbers = #tpu.dot_dimension_numbers<[1], [0], [0], [1], [0, 0, 1, 1], [], []>} : vector<16x32xf32>, vector<32x32xf32>, vector<16x32xf32> -> vector<16x32xf32>
    %70 = vector.broadcast %29 : vector<1x32xf32> to vector<16x32xf32>
    %71 = arith.addf %69, %70 : vector<16x32xf32>
    %cst_28 = arith.constant 5.000000e-01 : f32
    %72 = vector.broadcast %cst_28 : f32 to vector<16x32xf32>
    %73 = arith.mulf %72, %71 : vector<16x32xf32>
    %cst_29 = arith.constant 0.707106769 : f32
    %74 = vector.broadcast %cst_29 : f32 to vector<16x32xf32>
    %75 = arith.mulf %71, %74 : vector<16x32xf32>
    %cst_30 = arith.constant 0.000000e+00 : f32
    %76 = vector.broadcast %cst_30 : f32 to vector<16x32xf32>
    %77 = arith.cmpf olt, %75, %76 : vector<16x32xf32>
    %cst_31 = arith.constant -1.000000e+00 : f32
    %cst_32 = arith.constant 1.000000e+00 : f32
    %78 = vector.broadcast %cst_31 : f32 to vector<16x32xf32>
    %79 = vector.broadcast %cst_32 : f32 to vector<16x32xf32>
    %80 = arith.select %77, %78, %79 : vector<16x32xi1>, vector<16x32xf32>
    %81 = math.absf %75 : vector<16x32xf32>
    %cst_33 = arith.constant 0.327591091 : f32
    %82 = vector.broadcast %cst_33 : f32 to vector<16x32xf32>
    %83 = arith.mulf %82, %81 : vector<16x32xf32>
    %cst_34 = arith.constant 1.000000e+00 : f32
    %84 = vector.broadcast %cst_34 : f32 to vector<16x32xf32>
    %85 = arith.addf %84, %83 : vector<16x32xf32>
    %cst_35 = arith.constant 1.000000e+00 : f32
    %86 = vector.broadcast %cst_35 : f32 to vector<16x32xf32>
    %87 = arith.divf %86, %85 : vector<16x32xf32>
    %cst_36 = arith.constant 1.06140542 : f32
    %88 = vector.broadcast %cst_36 : f32 to vector<16x32xf32>
    %89 = arith.mulf %88, %87 : vector<16x32xf32>
    %cst_37 = arith.constant -1.45315206 : f32
    %90 = vector.broadcast %cst_37 : f32 to vector<16x32xf32>
    %91 = arith.addf %89, %90 : vector<16x32xf32>
    %92 = arith.mulf %91, %87 : vector<16x32xf32>
    %cst_38 = arith.constant 1.42141378 : f32
    %93 = vector.broadcast %cst_38 : f32 to vector<16x32xf32>
    %94 = arith.addf %92, %93 : vector<16x32xf32>
    %95 = arith.mulf %94, %87 : vector<16x32xf32>
    %cst_39 = arith.constant -0.284496725 : f32
    %96 = vector.broadcast %cst_39 : f32 to vector<16x32xf32>
    %97 = arith.addf %95, %96 : vector<16x32xf32>
    %98 = arith.mulf %97, %87 : vector<16x32xf32>
    %cst_40 = arith.constant 0.254829586 : f32
    %99 = vector.broadcast %cst_40 : f32 to vector<16x32xf32>
    %100 = arith.addf %98, %99 : vector<16x32xf32>
    %101 = arith.mulf %100, %87 : vector<16x32xf32>
    %cst_41 = arith.constant 0.000000e+00 : f32
    %102 = vector.broadcast %cst_41 : f32 to vector<16x32xf32>
    %103 = arith.subf %102, %81 : vector<16x32xf32>
    %104 = arith.mulf %103, %81 : vector<16x32xf32>
    %105 = math.exp %104 : vector<16x32xf32>
    %106 = arith.mulf %101, %105 : vector<16x32xf32>
    %cst_42 = arith.constant 1.000000e+00 : f32
    %107 = vector.broadcast %cst_42 : f32 to vector<16x32xf32>
    %108 = arith.subf %107, %106 : vector<16x32xf32>
    %109 = arith.mulf %80, %108 : vector<16x32xf32>
    %cst_43 = arith.constant 1.000000e+00 : f32
    %110 = vector.broadcast %cst_43 : f32 to vector<16x32xf32>
    %111 = arith.addf %110, %109 : vector<16x32xf32>
    %112 = arith.mulf %73, %111 : vector<16x32xf32>
    %113 = arith.addf %68, %112 : vector<16x32xf32>
    %cst_44 = arith.constant dense<0.000000e+00> : vector<16xf32>
    %114 = vector.multi_reduction <add>, %113, %cst_44 [1] : vector<16x32xf32> to vector<16xf32>
    %115 = vector.shape_cast %114 : vector<16xf32> to vector<16x1xf32>
    %cst_45 = arith.constant 3.200000e+01 : f32
    %116 = vector.broadcast %cst_45 : f32 to vector<16x1xf32>
    %117 = arith.divf %115, %116 : vector<16x1xf32>
    %118 = vector.broadcast %117 : vector<16x1xf32> to vector<16x32xf32>
    %119 = arith.subf %113, %118 : vector<16x32xf32>
    %120 = arith.mulf %119, %119 : vector<16x32xf32>
    %cst_46 = arith.constant dense<0.000000e+00> : vector<16xf32>
    %121 = vector.multi_reduction <add>, %120, %cst_46 [1] : vector<16x32xf32> to vector<16xf32>
    %122 = vector.shape_cast %121 : vector<16xf32> to vector<16x1xf32>
    %cst_47 = arith.constant 3.200000e+01 : f32
    %123 = vector.broadcast %cst_47 : f32 to vector<16x1xf32>
    %124 = arith.divf %122, %123 : vector<16x1xf32>
    %cst_48 = arith.constant 9.99999974E-6 : f32
    %125 = vector.broadcast %cst_48 : f32 to vector<16x1xf32>
    %126 = arith.addf %124, %125 : vector<16x1xf32>
    %127 = math.rsqrt %126 : vector<16x1xf32>
    %128 = vector.broadcast %127 : vector<16x1xf32> to vector<16x32xf32>
    %129 = arith.mulf %119, %128 : vector<16x32xf32>
    %130 = vector.broadcast %32 : vector<1x32xf32> to vector<16x32xf32>
    %131 = arith.mulf %129, %130 : vector<16x32xf32>
    %132 = vector.broadcast %33 : vector<1x32xf32> to vector<16x32xf32>
    %133 = arith.addf %131, %132 : vector<16x32xf32>
    %134 = vector.broadcast %34 : vector<1x32xf32> to vector<16x32xf32>
    %135 = arith.mulf %1, %134 : vector<16x32xf32>
    %cst_49 = arith.constant 1.000000e+00 : f32
    %136 = vector.broadcast %cst_49 : f32 to vector<1x32xf32>
    %137 = arith.subf %136, %34 : vector<1x32xf32>
    %138 = vector.broadcast %137 : vector<1x32xf32> to vector<16x32xf32>
    %139 = arith.mulf %133, %138 : vector<16x32xf32>
    %140 = arith.addf %135, %139 : vector<16x32xf32>
    %cst_50 = arith.constant 0.000000e+00 : f32
    %141 = vector.broadcast %cst_50 : f32 to vector<16x96xf32>
    %142 = tpu.concatenate %140, %141 in 1 : vector<16x32xf32>, vector<16x96xf32> -> vector<16x128xf32>
    %c0_51 = arith.constant 0 : index
    %c0_52 = arith.constant 0 : index
    %143 = vector.load %arg4[%c0_51, %c0_52] : memref<16x128xf32, #tpu.memory_space<vmem>>, vector<16x128xf32>
    tpu.vector_store %arg4[%c0_51, %c0_52], %142 {strides = array<i32>} : memref<16x128xf32, #tpu.memory_space<vmem>>, vector<16x128xf32>,
    return
  }
}

</mosaic_0001>

<bundles_post_ra>
// kernel: tpu_custom_call.1
= control target key start
LH: loop header
LB: loop body
LE: loop exit
PB: predicated region body
PF: predicated region fallthrough
CT: control target
= control target key end

     0   :  { %vm41_vm0 = vcmask 588800   ;;  %s1665_s0 = inlined_call_operand.vmem [shape: f32[32,72], index: 0, kind: input, shape index: {}]   ;;  %s1666_s1 = inlined_call_operand.vmem [shape: f32[80,32], index: 1, kind: input, shape index: {}]   ;;  %s1667_s2 = inlined_call_operand.vmem [shape: f32[216,16], index: 2, kind: input, shape index: {}]   ;;  %s1668_s3 = inlined_call_operand.vmem [shape: f32[72,32], index: 3, kind: input, shape index: {}]   ;;  %s1669_s4 = inlined_call_operand.hbm [shape: f32[16,128], index: 4, kind: output, shape index: {}]  }
   0x1   :  { %v139_v0 = vld [vmem:[%s1667_s2 + $0x48] sm:$0xff]  ;;  %v140_v1 = vld [vmem:[%s1667_s2 + $0x50] sm:$0xff]  ;;  %v141_v2 = vld [vmem:[%s1667_s2 + $0x58] sm:$0xff] }
   0x2   :  { %v1263_v3 = vpack.c.bf16 %v140_v1, %v139_v0  ;;  %v142_v4 = vld [vmem:[%s1667_s2 + $0x60] sm:$0xff]  ;;  %v143_v6 = vld [vmem:[%s1667_s2 + $0x68] sm:$0xff]  ;;  %v144_v7 = vld [vmem:[%s1667_s2 + $0x70] sm:$0xff] }
   0x3   :  { %v1267_v5 = vpack.c.bf16 %v142_v4, %v141_v2  ;;  %v32_v8 = vld [vmem:[%s1667_s2] sm:$0xff]  ;;  %v33_v9 = vld [vmem:[%s1667_s2 + $0x8] sm:$0xff]  ;;  %v34_v12 = vld [vmem:[%s1667_s2 + $0x10] sm:$0xff]  ;;  %v1271_v14 = vpack.c.bf16 %v144_v7, %v143_v6 }
   0x4   :  { %1264 = vmatprep.subr.bf16.mxu1 %v1263_v3  ;;  %v18_v10 = vld [vmem:[%s1665_s0] sm:$0xff]  ;;  %v1247_v11 = vpack.c.bf16 %v33_v9, %v32_v8  ;;  %v35_v13 = vld [vmem:[%s1667_s2 + $0x18] sm:$0xff]  ;;  %v37_v17 = vld [vmem:[%s1667_s2 + $0x28] sm:$0xff] }
   0x5   :  { %1266 = vmatpush3.bf16.msra.mxu1 %v1263_v3  ;;  %1164 = vmatprep.mubr.msk.f32.mxu1 %vm41_vm0, %v18_v10  ;;  %v1251_v15 = vpack.c.bf16 %v35_v13, %v34_v12  ;;  %v36_v16 = vld [vmem:[%s1667_s2 + $0x20] sm:$0xff]  ;;  %v145_v18 = vld [vmem:[%s1667_s2 + $0x78] sm:$0xff] }
   0x6   :  { %1268 = vmatprep.subr.bf16.mxu1 %v1267_v5  ;;  %1140 = vmatprep.mubr.msk.f32.mxu0 %vm41_vm0, %v18_v10  ;;  %v146_v19 = vld [vmem:[%s1667_s2 + $0x80] sm:$0xff] }
   0x7   :  { %1248 = vmatprep.subr.bf16.mxu0 %v1247_v11 }
   0x8   :  { %1250 = vmatpush3.bf16.msra.mxu0 %v1247_v11 }
   0x9   :  { %9 = vsyncpa [#allocation3], 0  ;;  %1270 = vmatpush3.bf16.msra.mxu1 %v1267_v5  ;;  %1252 = vmatprep.subr.bf16.mxu0 %v1251_v15  ;;  %v1255_v20 = vpack.c.bf16 %v37_v17, %v36_v16  ;;  %v1275_v21 = vpack.c.bf16 %v146_v19, %v145_v18  ;;  %v38_v22 = vld [vmem:[%s1667_s2 + $0x30] sm:$0xff]  ;;  %v39_v23 = vld [vmem:[%s1667_s2 + $0x38] sm:$0xff]  ;;  %vm327_vm1 = vcmask 130048   ;;  %vm449_vm3 = vcmask 261120  }
   0xa   :  { %1272 = vmatprep.subr.bf16.mxu1 %v1271_v14  ;;  %v1259_v24 = vpack.c.bf16 %v39_v23, %v38_v22  ;;  %v147_v25 = vld [vmem:[%s1667_s2 + $0x88] sm:$0xff]  ;;  %v40_v26 = vld [vmem:[%s1667_s2 + $0x40] sm:$0xff]  ;;  %v20_v28 = vld [vmem:[%s1665_s0 + $0x10] sm:$0xff] }
   0xb   :  { %v19_v27 = vld [vmem:[%s1665_s0 + $0x8] sm:$0xff]  ;;  %v21_v29 = vld [vmem:[%s1665_s0 + $0x18] sm:$0xff]  ;;  %vm1296_vm2 = vmpackc.low %vm327_vm1, %vm327_vm1 }
   0xc   :  { %1254 = vmatpush3.bf16.msra.mxu0 %v1251_v15  ;;  %v233_v40 = vld [vmem:[%s1667_s2 + $0x90] sm:$0xff]  ;;  %v234_v41 = vld [vmem:[%s1667_s2 + $0x98] sm:$0xff]  ;;  %v235_v42 = vld [vmem:[%s1667_s2 + $0xa0] sm:$0xff] }
   0xd   :  { %1274 = vmatpush3.bf16.msra.mxu1 %v1271_v14  ;;  %1256 = vmatprep.subr.bf16.mxu0 %v1255_v20  ;;  %v1279_v43 = vpack.c.bf16 %v234_v41, %v233_v40  ;;  %v236_v44 = vld [vmem:[%s1667_s2 + $0xa8] sm:$0xff]  ;;  %v237_v46 = vld [vmem:[%s1667_s2 + $0xb0] sm:$0xff]  ;;  %v238_v47 = vld [vmem:[%s1667_s2 + $0xb8] sm:$0xff] }
   0xe   :  { %1276 = vmatprep.subr.bf16.mxu1 %v1275_v21  ;;  %v1283_v45 = vpack.c.bf16 %v236_v44, %v235_v42  ;;  %v1287_v48 = vpack.c.bf16 %v238_v47, %v237_v46  ;;  %v239_v49 = vld [vmem:[%s1667_s2 + $0xc0] sm:$0xff]  ;;  %v240_v50 = vld [vmem:[%s1667_s2 + $0xc8] sm:$0xff]  ;;  %v241_v52 = vld [vmem:[%s1667_s2 + $0xd0] sm:$0xff] }
   0xf   :  { %v1291_v51 = vpack.c.bf16 %v240_v50, %v239_v49  ;;  %v25_v54 = vld [vmem:[%s1666_s1 + $0x18] sm:$0xff]  ;;  %v24_v56 = vld [vmem:[%s1666_s1 + $0x10] sm:$0xff]  ;;  %v27_v63 = vld [vmem:[%s1666_s1 + $0x28] sm:$0xff] }
  0x10   :  { %1258 = vmatpush3.bf16.msra.mxu0 %v1255_v20  ;;  %v28_v59 = vld [vmem:[%s1666_s1 + $0x30] sm:$0xff]  ;;  %v26_v1 = vld [vmem:[%s1666_s1 + $0x20] sm:$0xff]  ;;  %v29_v3 = vld [vmem:[%s1666_s1 + $0x38] sm:$0xff] }
  0x11   :  { %1278 = vmatpush3.bf16.msra.mxu1 %v1275_v21  ;;  %1260 = vmatprep.subr.bf16.mxu0 %v1259_v24  ;;  %v30_v6 = vld [vmem:[%s1666_s1 + $0x40] sm:$0xff]  ;;  %v31_v11 = vld [vmem:[%s1666_s1 + $0x48] sm:$0xff]  ;;  %v594_v44 = vld [vmem:[%s1668_s3 + $0x18] sm:$0xff] }
  0x12   :  { %1162 = vmatprep.subr.mxu1 %v147_v25 }
  0x14   :  { %1262 = vmatpush3.bf16.msra.mxu0 %v1259_v24 }
  0x15   :  { %1163 = vmatpush3.msra.mxu1 %v147_v25  ;;  %1138 = vmatprep.subr.mxu0 %v40_v26 }
  0x16   :  { %1165 = vmatmul.mubr.msk.f32.vlgmr.msra.gmra.mrb[0].mxu1 %vm41_vm0, %v19_v27 }
  0x17   :  { %1167 = vmatprep.mubr.msk.f32.mxu1 %vm41_vm0, %v20_v28 }
  0x18   :  { %1139 = vmatpush3.msra.mxu0 %v40_v26 }
  0x19   :  { %1141 = vmatmul.mubr.msk.f32.vlgmr.msra.gmra.mrb[0].mxu0 %vm41_vm0, %v19_v27  ;;  %1280 = vmatprep.subr.bf16.mxu0 %v1279_v43 }
  0x1a   :  { %1168 = vmatmul.mubr.msk.f32.gmra.mrb[2].mxu1 %vm41_vm0, %v21_v29  ;;  %1143 = vmatprep.mubr.msk.f32.mxu0 %vm41_vm0, %v20_v28 }
  0x1b   :  { %1282 = vmatpush3.bf16.msra.mxu0 %v1279_v43  ;;  %v593_v43 = vld [vmem:[%s1668_s3 + $0x10] sm:$0xff] }
  0x1c   :  { %1284 = vmatprep.subr.bf16.mxu0 %v1283_v45 }
  0x1d   :  { %1144 = vmatmul.mubr.msk.f32.gmra.mrb[2].mxu0 %vm41_vm0, %v21_v29 }
  0x1e   :  { %1188 = vmatprep.mubr.msk.f32.mxu0 %vm41_vm0, %v18_v10 }
  0x1f   :  { %1286 = vmatpush3.bf16.msra.mxu0 %v1283_v45  ;;  %v1315_v45 = vpack.c.bf16 %v594_v44, %v593_v43 }
  0x20   :  { %1288 = vmatprep.subr.bf16.mxu0 %v1287_v48 }
  0x23   :  { %1290 = vmatpush3.bf16.msra.mxu0 %v1287_v48 }
  0x24   :  { %1292 = vmatprep.subr.bf16.mxu0 %v1291_v51 }
  0x27   :  { %1294 = vmatpush3.bf16.msra.mxu0 %v1291_v51 }
  0x28   :  { %1186 = vmatprep.subr.mxu0 %v241_v52 }
  0x2b   :  { %1187 = vmatpush3.msra.mxu0 %v241_v52 }
  0x2c   :  { %1189 = vmatmul.mubr.msk.f32.vlgmr.msra.gmra.mrb[4].mxu0 %vm41_vm0, %v19_v27  ;;  %1316 = vmatprep.subr.bf16.mxu0 %v1315_v45 }
  0x2d   :  { %1191 = vmatprep.mubr.msk.f32.mxu0 %vm41_vm0, %v20_v28  ;;  %1318 = vmatpush3.bf16.msra.mxu0 %v1315_v45 }
  0x30   :  { %1192 = vmatmul.mubr.msk.f32.gmra.mrb[6].mxu0 %vm41_vm0, %v21_v29 }
  0xe9   :  { %v1166_v30 = vpop.f32.mrb[0].mxu1 }
  0xea   :  { %v214_v31 = vpop.f32.mrb[1].mxu1 }
  0xeb   :  { %v1295_v32 = vpack.c.bf16 %v1166_v30, %v214_v31 }
  0xec   :  { %v1142_v33 = vpop.f32.mrb[0].mxu0 }
  0xed   :  { %1297 = vmatprep.subr.msk.bf16.mxu1 %vm1296_vm2, %v1295_v32  ;;  %v1169_v34 = vpop.f32.mrb[2].mxu1  ;;  %v120_v35 = vpop.f32.mrb[1].mxu0 }
  0xee   :  { %1300 = vmatpush3.bf16.xpose.msk.msra.mxu1 %vm1296_vm2, %v1295_v32  ;;  %v224_v36 = vpop.f32.mrb[3].mxu1  ;;  %1202 = vmatprep.mubr.msk.f32.mxu1 %vm327_vm1, %v120_v35 }
  0xef   :  { %v1301_v37 = vpack.c.bf16 %v1169_v34, %v224_v36 }
  0xf0   :  { %v1145_v38 = vpop.f32.mrb[2].mxu0 }
  0xf1   :  { %1303 = vmatprep.subr.msk.bf16.mxu1 %vm1296_vm2, %v1301_v37  ;;  %v130_v39 = vpop.f32.mrb[3].mxu0 }
  0xf6   :  { %1306 = vmatpush3.bf16.xpose.msk.msra.mxu1 %vm1296_vm2, %v1301_v37 }
  0xfd   :  { %1203 = vmatmul.mubr.msk.f32.vlgmr.msra.gmra.mrb[4].mxu1 %vm327_vm1, %v1142_v33 }
  0xfe   :  { %1205 = vmatprep.mubr.msk.f32.mxu1 %vm327_vm1, %v130_v39 }
  0xff   :  { %v1190_v37 = vpop.f32.mrb[4].mxu0 }
 0x101   :  { %1206 = vmatmul.mubr.msk.f32.gmra.mrb[6].mxu1 %vm327_vm1, %v1145_v38  ;;  %v308_v38 = vpop.f32.mrb[5].mxu0 }
 0x102   :  { %v1307_v39 = vpack.c.bf16 %v1190_v37, %v308_v38 }
 0x103   :  { %v1193_v40 = vpop.f32.mrb[6].mxu0 }
 0x104   :  { %1308 = vmatprep.subr.bf16.mxu1 %v1307_v39  ;;  %v318_v41 = vpop.f32.mrb[7].mxu0 }
 0x105   :  { %1310 = vmatpush3.bf16.msra.mxu1 %v1307_v39  ;;  %v1311_v42 = vpack.c.bf16 %v1193_v40, %v318_v41 }
 0x107   :  { %1312 = vmatprep.subr.bf16.mxu1 %v1311_v42 }
 0x109   :  { %1314 = vmatpush3.bf16.msra.mxu1 %v1311_v42 }
 0x1d0   :  { %v1204_v53 = vpop.f32.mrb[4].mxu1 }
 0x1d1   :  { %v438_v55 = vmul.f32 0.25, %v1204_v53  ;;  %v418_v57 = vpop.f32.mrb[5].mxu1 }
 0x1d2   :  { %v437_v58 = vmul.f32 0.25, %v418_v57 }
 0x1d3   :  { %v442_v60 = vmul.f32 %v438_v55, %v25_v54 }
 0x1d4   :  { %v441_v61 = vmul.f32 %v437_v58, %v24_v56  ;;  %v1207_v62 = vpop.f32.mrb[6].mxu1  ;;  %v591_v58 = vld [vmem:[%s1668_s3] sm:$0xff] }
 0x1d5   :  { %v440_v0 = vmul.f32 0.25, %v1207_v62  ;;  %v428_v2 = vpop.f32.mrb[7].mxu1  ;;  %v446_v10 = vadd.f32 %v442_v60, %v29_v3 }
 0x1d6   :  { %v439_v4 = vmul.f32 0.25, %v428_v2  ;;  %v445_v5 = vadd.f32 %v441_v61, %v28_v59  ;;  %v592_v59 = vld [vmem:[%s1668_s3 + $0x8] sm:$0xff] }
 0x1d7   :  { %v444_v7 = vmul.f32 %v440_v0, %v27_v63  ;;  %v453_v13 = vsel %vm449_vm3, %v446_v10, -inf  ;;  %v1319_v60 = vpack.c.bf16 %v592_v59, %v591_v58 }
 0x1d8   :  { %v443_v8 = vmul.f32 %v439_v4, %v26_v1  ;;  %v450_v9 = vsel %vm449_vm3, %v445_v5, -inf  ;;  %v762_v1 = vlaneseq  ;;  %v1591_v4 = vld [vmem:[%s1668_s3 + $0x40] sm:$0xff] }
 0x1d9   :  { %451 = vmax.xlane.f32.xlu0 %v450_v9  ;;  %v448_v15 = vadd.f32 %v444_v7, %v31_v11  ;;  %1320 = vmatprep.subr.bf16.mxu0 %v1319_v60  ;;  %v1597_v7 = vld [vmem:[%s1666_s1 + $0x8] sm:$0xff] }
 0x1da   :  { %v447_v12 = vadd.f32 %v443_v8, %v30_v6  ;;  %v1585_v2 = vshrl.u32 %v762_v1, 7 }
 0x1db   :  { %v459_v16 = vsel %vm449_vm3, %v448_v15, -inf }
 0x1dc   :  { %v456_v14 = vsel %vm449_vm3, %v447_v12, -inf  ;;  %v764_v3 = vsub.s32 0, %v1585_v2  ;;  %v799_v38 = vsub.s32 2, %v1585_v2  ;;  %v805_v39 = vsub.s32 3, %v1585_v2 }
 0x1dd   :  { %454 = vmax.xlane.f32.xlu0 %v453_v13  ;;  %457 = vmax.xlane.f32.xlu1 %v456_v14 }
 0x1de   :  { %v800_v40 = vrot.slane %v1591_v4, %v799_v38  ;;  %v806_v45 = vrot.slane %v1591_v4, %v805_v39 }
 0x1e1   :  { %460 = vmax.xlane.f32.xlu1 %v459_v16 }
 0x266   :  { %v452_v17 = vpop.xlane.xlu0 %451 }
 0x267   :  { %v462_v18 = vsub.f32 %v445_v5, %v452_v17  ;;  %v765_v5 = vrot.slane %v1591_v4, %v764_v3 }
 0x269   :  { %v466_v19 = vmul.f32 1.442695, %v462_v18 }
 0x26a   :  { %v455_v20 = vpop.xlane.xlu0 %454  ;;  %v458_v21 = vpop.xlane.xlu1 %457 }
 0x26b   :  { %1337 = vpow2.f32 %v466_v19  ;;  %v463_v22 = vsub.f32 %v446_v10, %v455_v20  ;;  %v464_v23 = vsub.f32 %v447_v12, %v458_v21  ;;  %v1602_v10 = vld [vmem:[%s1666_s1] sm:$0xff] }
 0x26d   :  { %v468_v24 = vmul.f32 1.442695, %v463_v22  ;;  %v470_v25 = vmul.f32 1.442695, %v464_v23 }
 0x26e   :  { %v461_v26 = vpop.xlane.xlu1 %460 }
 0x26f   :  { %1339 = vpow2.f32 %v468_v24  ;;  %v465_v27 = vsub.f32 %v448_v15, %v461_v26  ;;  %v595_v26 = vld [vmem:[%s1668_s3 + $0x20] sm:$0xff] }
 0x270   :  { %1341 = vpow2.f32 %v470_v25 }
 0x271   :  { %v472_v28 = vmul.f32 1.442695, %v465_v27  ;;  %v596_v27 = vld [vmem:[%s1668_s3 + $0x28] sm:$0xff] }
 0x273   :  { %1343 = vpow2.f32 %v472_v28  ;;  %v1323_v28 = vpack.c.bf16 %v596_v27, %v595_v26 }
 0x275   :  { %v1338_v29 = vpop.eup %1337  ;;  %1324 = vmatprep.subr.bf16.mxu1 %v1323_v28 }
 0x276   :  { %v474_v30 = vsel %vm449_vm3, %v1338_v29, 0.0 }
 0x277   :  { %475 = vadd.xlane.f32.xlu0 %v474_v30  ;;  %v598_v30 = vld [vmem:[%s1668_s3 + $0x38] sm:$0xff] }
 0x279   :  { %v1340_v31 = vpop.eup %1339 }
 0x27a   :  { %v1342_v32 = vpop.eup %1341  ;;  %v477_v33 = vsel %vm449_vm3, %v1340_v31, 0.0 }
 0x27b   :  { %478 = vadd.xlane.f32.xlu1 %v477_v33  ;;  %v480_v34 = vsel %vm449_vm3, %v1342_v32, 0.0 }
 0x27c   :  { %481 = vadd.xlane.f32.xlu0 %v480_v34 }
 0x27d   :  { %v1344_v35 = vpop.eup %1343 }
 0x27e   :  { %v483_v36 = vsel %vm449_vm3, %v1344_v35, 0.0 }
 0x27f   :  { %484 = vadd.xlane.f32.xlu1 %v483_v36 }
 0x304   :  { %v476_v46 = vpop.xlane.xlu0 %475 }
 0x305   :  { %1345 = vrcp.f32 %v476_v46 }
 0x308   :  { %v479_v47 = vpop.xlane.xlu1 %478 }
 0x309   :  { %v482_v48 = vpop.xlane.xlu0 %481  ;;  %1347 = vrcp.f32 %v479_v47 }
 0x30a   :  { %1349 = vrcp.f32 %v482_v48 }
 0x30c   :  { %v485_v49 = vpop.xlane.xlu1 %484 }
 0x30d   :  { %1351 = vrcp.f32 %v485_v49 }
 0x30f   :  { %v1346_v50 = vpop.eup %1345 }
 0x310   :  { %v487_v51 = vmul.f32 %v1346_v50, %v1338_v29  ;;  %v597_v29 = vld [vmem:[%s1668_s3 + $0x30] sm:$0xff]  ;;  %v811_v50 = vsub.s32 1, %v1585_v2  ;;  %s1394_s3 = smov [#allocation2]  }
 0x311   :  { %s1012_s6 = sshll.u32 %s1394_s3, 4  ;;  %s1013_s6 = int_to_ptr.vmem [resolvable:$true] %s1012_s6 }
 0x312   :  { %1216 = vmatprep.mubr.msk.f32.mxu1 %vm449_vm3, %v487_v51  ;;  %v812_v51 = vrot.slane %v1591_v4, %v811_v50  ;;  %s1369_s0 = scalar_lea.vmem %s1013_s6, 256  ;;  %p1374_p1 = scmp.lt.s32.totalorder %s1013_s6, %s1013_s6 }
 0x313   :  { %v1348_v52 = vpop.eup %1347  ;;  %p1370_p0 = scmp.ne.s32.totalorder %s1013_s6, %s1369_s0  ;;  %p1375_p2 = scmp.lt.s32.totalorder %s1369_s0, %s1369_s0 }
 0x314   :  { %v1350_v53 = vpop.eup %1349  ;;  %v489_v54 = vmul.f32 %v1348_v52, %v1340_v31  ;;  %v1327_v31 = vpack.c.bf16 %v598_v30, %v597_v29 }
 0x315   :  { %v491_v55 = vmul.f32 %v1350_v53, %v1342_v32  ;;  %p1376_p3 = por %p1375_p2, %p1374_p1 }
 0x316   :  { %1217 = vmatmul.mubr.msk.f32.vlgmr.msra.gmra.mrb[8].mxu1 %vm449_vm3, %v489_v54 }
 0x317   :  { %v1352_v56 = vpop.eup %1351  ;;  %1219 = vmatprep.mubr.msk.f32.mxu1 %vm449_vm3, %v491_v55  ;;  %1326 = vmatpush3.bf16.msra.mxu1 %v1323_v28  ;;  %p1377_p4 = pnand %p1376_p3, %p1370_p0 }
 0x318   :  { %v493_v57 = vmul.f32 %v1352_v56, %v1344_v35  ;;  %1328 = vmatprep.subr.bf16.mxu1 %v1327_v31 }
 0x31a   :  { %1220 = vmatmul.mubr.msk.f32.gmra.mrb[10].mxu1 %vm449_vm3, %v493_v57 }
 0x31b   :  { %1330 = vmatpush3.bf16.msra.mxu1 %v1327_v31 }
 0x3e9   :  { %v1218_v61 = vpop.f32.mrb[8].mxu1 }
 0x3ea   :  { %v572_v62 = vpop.f32.mrb[9].mxu1  ;;  %1226 = vmatprep.mubr.msk.f32.mxu0 %vm327_vm1, %v1218_v61 }
 0x3ed   :  { %v1221_v63 = vpop.f32.mrb[10].mxu1 }
 0x3ee   :  { %v582_v0 = vpop.f32.mrb[11].mxu1  ;;  %1227 = vmatmul.mubr.msk.f32.vlgmr.msra.gmra.mrb[8].mxu0 %vm327_vm1, %v1221_v63 }
 0x3ef   :  { %1322 = vmatpush3.bf16.msra.mxu0 %v1319_v60  ;;  %1233 = vmatprep.mubr.msk.f32.mxu0 %vm327_vm1, %v572_v62 }
 0x3f6   :  { %1234 = vmatmul.mubr.msk.f32.vlgmr.msra.gmra.mrb[8].mxu0 %vm327_vm1, %v582_v0 }
 0x4c9   :  { %v1235_v6 = vpop.f32.mrb[8].mxu0 }
 0x4ca   :  { %v767_v8 = vadd.f32 %v1235_v6, %v765_v5  ;;  %v753_v9 = vpop.f32.mrb[9].mxu0 }
 0x4cb   :  { %v766_v11 = vadd.f32 %v765_v5, %v753_v9 }
 0x4cc   :  { %v769_v12 = vadd.f32 %v767_v8, %v1597_v7 }
 0x4cd   :  { %v768_v13 = vadd.f32 %v766_v11, %v1602_v10 }
 0x4ce   :  { %v773_v14 = vsel %vm449_vm3, %v769_v12, 0.0 }
 0x4cf   :  { %774 = vadd.xlane.f32.xlu1 %v773_v14  ;;  %v770_v15 = vsel %vm449_vm3, %v768_v13, 0.0 }
 0x4d0   :  { %771 = vadd.xlane.f32.xlu0 %v770_v15 }
 0x55c   :  { %v775_v16 = vpop.xlane.xlu1 %774 }
 0x55d   :  { %v778_v17 = vmul.f32 0.03125, %v775_v16  ;;  %v772_v18 = vpop.xlane.xlu0 %771 }
 0x55e   :  { %v777_v19 = vmul.f32 0.03125, %v772_v18 }
 0x55f   :  { %v780_v20 = vsub.f32 %v769_v12, %v778_v17 }
 0x560   :  { %v779_v21 = vsub.f32 %v768_v13, %v777_v19 }
 0x561   :  { %v782_v22 = vmul.f32 %v780_v20, %v780_v20 }
 0x562   :  { %v781_v23 = vmul.f32 %v779_v21, %v779_v21 }
 0x563   :  { %v786_v24 = vsel %vm449_vm3, %v782_v22, 0.0 }
 0x564   :  { %787 = vadd.xlane.f32.xlu1 %v786_v24  ;;  %v783_v25 = vsel %vm449_vm3, %v781_v23, 0.0 }
 0x565   :  { %784 = vadd.xlane.f32.xlu0 %v783_v25 }
 0x5f1   :  { %v788_v32 = vpop.xlane.xlu1 %787 }
 0x5f2   :  { %v790_v33 = vmul.f32 0.03125, %v788_v32  ;;  %v785_v34 = vpop.xlane.xlu0 %784 }
 0x5f3   :  { %v789_v35 = vmul.f32 0.03125, %v785_v34 }
 0x5f4   :  { %v792_v36 = vadd.f32 1e-05, %v790_v33 }
 0x5f5   :  { %v791_v37 = vadd.f32 1e-05, %v789_v35  ;;  %v1393_v35 = vmov 1.0  }
 0x5f6   :  { %1353 = vrsqrt.f32 %v792_v36 }
 0x5f7   :  { %1355 = vrsqrt.f32 %v791_v37 }
 0x600   :  { %v1354_v41 = vpop.eup %1353 }
 0x601   :  { %v1356_v42 = vpop.eup %1355  ;;  %v796_v43 = vmul.f32 %v1354_v41, %v780_v20 }
 0x602   :  { %v795_v44 = vmul.f32 %v1356_v42, %v779_v21 }
 0x603   :  { %v802_v46 = vmul.f32 %v800_v40, %v796_v43 }
 0x604   :  { %v801_v47 = vmul.f32 %v800_v40, %v795_v44 }
 0x605   :  { %v1628_v49 = vadd.f32 %v806_v45, %v802_v46 }
 0x606   :  { %v1626_v48 = vadd.f32 %v806_v45, %v801_v47 }
 0x608   :  { %1244 = vmatprep.mubr.msk.f32.mxu1 %vm449_vm3, %v1626_v48 }
 0x609   :  { %1245 = vmatmul.mubr.msk.f32.vlgmr.msra.gmra.mrb[12].mxu1 %vm449_vm3, %v1628_v49 }
 0x6dc   :  { %v1246_v52 = vpop.f32.mrb[12].mxu1 }
 0x6dd   :  { %v891_v53 = vadd.f32 %v1246_v52, %v812_v51  ;;  %v885_v54 = vpop.f32.mrb[13].mxu1 }
 0x6de   :  { %v886_v55 = vadd.f32 %v885_v54, %v812_v51 }
 0x6df   :  { %v897_v56 = vmul.f32 0.70710677, %v891_v53  ;;  %v895_v41 = vmul.f32 0.5, %v891_v53 }
 0x6e0   :  { %v896_v57 = vmul.f32 0.70710677, %v886_v55  ;;  %v894_v43 = vmul.f32 0.5, %v886_v55 }
 0x6e1   :  { %v903_v58 = vand.u32 2147483647, %v897_v56  ;;  %vm899_vm4 = vcmp.lt.f32.partialorder %v897_v56, 0.0 }
 0x6e2   :  { %v902_v59 = vand.u32 2147483647, %v896_v57  ;;  %vm898_vm5 = vcmp.lt.f32.partialorder %v896_v57, 0.0  ;;  %v901_v36 = vsel %vm899_vm4, -1.0, %v1393_v35 }
 0x6e3   :  { %v905_v60 = vmul.f32 0.3275911, %v903_v58  ;;  %v931_v0 = vsub.f32 0.0, %v903_v58  ;;  %v900_v39 = vsel %vm898_vm5, -1.0, %v1393_v35 }
 0x6e4   :  { %v904_v61 = vmul.f32 0.3275911, %v902_v59  ;;  %v930_v1 = vsub.f32 0.0, %v902_v59 }
 0x6e5   :  { %v907_v62 = vadd.f32 1.0, %v905_v60  ;;  %v933_v5 = vmul.f32 %v931_v0, %v903_v58 }
 0x6e6   :  { %v906_v63 = vadd.f32 1.0, %v904_v61  ;;  %v932_v9 = vmul.f32 %v930_v1, %v902_v59 }
 0x6e7   :  { %1357 = vrcp.f32 %v907_v62  ;;  %v936_v13 = vmul.f32 1.442695, %v933_v5  ;;  %v978_v5 = vsub.s32 4, %v1585_v2 }
 0x6e8   :  { %1359 = vrcp.f32 %v906_v63  ;;  %v934_v16 = vmul.f32 1.442695, %v932_v9  ;;  %v994_v9 = vsub.f32 1.0, %v1591_v4 }
 0x6e9   :  { %1361 = vpow2.f32 %v936_v13 }
 0x6ea   :  { %1363 = vpow2.f32 %v934_v16 }
 0x6f1   :  { %v1358_v3 = vpop.eup %1357 }
 0x6f2   :  { %v1360_v6 = vpop.eup %1359  ;;  %v913_v8 = vmul.f32 1.0614054, %v1358_v3 }
 0x6f3   :  { %v912_v11 = vmul.f32 1.0614054, %v1360_v6  ;;  %v1362_v29 = vpop.eup %1361 }
 0x6f4   :  { %v915_v12 = vadd.f32 -1.4531521, %v913_v8  ;;  %v1364_v31 = vpop.eup %1363  ;;  %v984_v8 = vsub.s32 5, %v1585_v2 }
 0x6f5   :  { %v914_v14 = vadd.f32 -1.4531521, %v912_v11  ;;  %v979_v11 = vrot.slane %v1591_v4, %v978_v5 }
 0x6f6   :  { %v917_v15 = vmul.f32 %v1358_v3, %v915_v12  ;;  %v985_v16 = vrot.slane %v1591_v4, %v984_v8 }
 0x6f7   :  { %v916_v17 = vmul.f32 %v1360_v6, %v914_v14 }
 0x6f8   :  { %v919_v18 = vadd.f32 1.4214138, %v917_v15 }
 0x6f9   :  { %v918_v19 = vadd.f32 1.4214138, %v916_v17 }
 0x6fa   :  { %v921_v20 = vmul.f32 %v1358_v3, %v919_v18 }
 0x6fb   :  { %v920_v21 = vmul.f32 %v1360_v6, %v918_v19 }
 0x6fc   :  { %v923_v22 = vadd.f32 -0.28449672, %v921_v20 }
 0x6fd   :  { %v922_v23 = vadd.f32 -0.28449672, %v920_v21 }
 0x6fe   :  { %v925_v24 = vmul.f32 %v1358_v3, %v923_v22 }
 0x6ff   :  { %v924_v25 = vmul.f32 %v1360_v6, %v922_v23 }
 0x700   :  { %v927_v26 = vadd.f32 0.2548296, %v925_v24 }
 0x701   :  { %v926_v27 = vadd.f32 0.2548296, %v924_v25 }
 0x702   :  { %v929_v28 = vmul.f32 %v1358_v3, %v927_v26 }
 0x703   :  { %v928_v30 = vmul.f32 %v1360_v6, %v926_v27  ;;  %v990_v6 = vsub.s32 6, %v1585_v2 }
 0x704   :  { %v939_v32 = vmul.f32 %v1362_v29, %v929_v28 }
 0x705   :  { %v938_v33 = vmul.f32 %v1364_v31, %v928_v30  ;;  %v991_v14 = vrot.slane %v1591_v4, %v990_v6  ;;  %v998_v18 = vrot.slane %v994_v9, %v990_v6 }
 0x706   :  { %v941_v34 = vsub.f32 1.0, %v939_v32 }
 0x707   :  { %v940_v37 = vsub.f32 1.0, %v938_v33  ;;  %v993_v21 = vmul.f32 %v991_v14, %v1597_v7  ;;  %v992_v2 = vmul.f32 %v991_v14, %v1602_v10 }
 0x708   :  { %v943_v38 = vmul.f32 %v941_v34, %v901_v36 }
 0x709   :  { %v942_v40 = vmul.f32 %v940_v37, %v900_v39 }
 0x70a   :  { %v945_v42 = vadd.f32 1.0, %v943_v38 }
 0x70b   :  { %v944_v44 = vadd.f32 1.0, %v942_v40 }
 0x70c   :  { %v947_v45 = vmul.f32 %v945_v42, %v895_v41 }
 0x70d   :  { %v946_v46 = vmul.f32 %v944_v44, %v894_v43 }
 0x70e   :  { %v949_v47 = vadd.f32 %v947_v45, %v1628_v49 }
 0x70f   :  { %v948_v50 = vadd.f32 %v946_v46, %v1626_v48 }
 0x710   :  { %v953_v51 = vsel %vm449_vm3, %v949_v47, 0.0 }
 0x711   :  { %954 = vadd.xlane.f32.xlu1 %v953_v51  ;;  %v950_v52 = vsel %vm449_vm3, %v948_v50, 0.0 }
 0x712   :  { %951 = vadd.xlane.f32.xlu0 %v950_v52 }
 0x79e   :  { %v955_v54 = vpop.xlane.xlu1 %954 }
 0x79f   :  { %v957_v56 = vmul.f32 0.03125, %v955_v54  ;;  %v952_v57 = vpop.xlane.xlu0 %951 }
 0x7a0   :  { %v956_v58 = vmul.f32 0.03125, %v952_v57 }
 0x7a1   :  { %v959_v53 = vsub.f32 %v949_v47, %v957_v56 }
 0x7a2   :  { %v958_v59 = vsub.f32 %v948_v50, %v956_v58 }
 0x7a3   :  { %v961_v55 = vmul.f32 %v959_v53, %v959_v53 }
 0x7a4   :  { %v960_v60 = vmul.f32 %v958_v59, %v958_v59 }
 0x7a5   :  { %v965_v61 = vsel %vm449_vm3, %v961_v55, 0.0 }
 0x7a6   :  { %966 = vadd.xlane.f32.xlu1 %v965_v61  ;;  %v962_v49 = vsel %vm449_vm3, %v960_v60, 0.0 }
 0x7a7   :  { %963 = vadd.xlane.f32.xlu0 %v962_v49 }
 0x833   :  { %v967_v48 = vpop.xlane.xlu1 %966 }
 0x834   :  { %v969_v62 = vmul.f32 0.03125, %v967_v48  ;;  %v964_v63 = vpop.xlane.xlu0 %963 }
 0x835   :  { %v968_v0 = vmul.f32 0.03125, %v964_v63 }
 0x836   :  { %v971_v1 = vadd.f32 1e-05, %v969_v62 }
 0x837   :  { %v970_v3 = vadd.f32 1e-05, %v968_v0 }
 0x838   :  { %1365 = vrsqrt.f32 %v971_v1 }
 0x839   :  { %1367 = vrsqrt.f32 %v970_v3 }
 0x842   :  { %v1366_v12 = vpop.eup %1365 }
 0x843   :  { %v1368_v13 = vpop.eup %1367  ;;  %v975_v15 = vmul.f32 %v1366_v12, %v959_v53 }
 0x844   :  { %v974_v17 = vmul.f32 %v1368_v13, %v958_v59 }
 0x845   :  { %v981_v19 = vmul.f32 %v979_v11, %v975_v15 }
 0x846   :  { %v980_v20 = vmul.f32 %v979_v11, %v974_v17 }
 0x847   :  { %v987_v22 = vadd.f32 %v985_v16, %v981_v19 }
 0x848   :  { %v986_v23 = vadd.f32 %v985_v16, %v980_v20 }
 0x849   :  { %v1000_v24 = vmul.f32 %v998_v18, %v987_v22 }
 0x84a   :  { %v999_v25 = vmul.f32 %v998_v18, %v986_v23 }
 0x84b   :  { %v1002_v26 = vadd.f32 %v1000_v24, %v993_v21 }
 0x84c   :  { %v1001_v27 = vadd.f32 %v999_v25, %v992_v2 }
 0x84d   :  { %v1004_v28 = vsel %vm449_vm3, %v1002_v26, 0.0 }
 0x84e   :  { %v1003_v4 = vsel %vm449_vm3, %v1001_v27, 0.0  ;;  %1006 = vst [vmem:[#allocation2 + $0x8] sm:$0xff] %v1004_v28 }
 0x84f   :  { %1005 = vst [vmem:[#allocation2] sm:$0xff] %v1003_v4 }
 0x850   :  { %1380 = shalt.err (!%p1377_p4)
}
 0x851   :  { %s1381_s9 = scalar_lea.hbm %s1669_s4, 256 }
 0x852   :  { %p1382_p5 = scmp.ne.s32.totalorder %s1669_s4, %s1381_s9  ;;  %p1385_p6 = scmp.lt.u32.totalorder %s1381_s9, %s1669_s4 }
 0x854   :  { %p1387_p7 = pnand %p1385_p6, %p1382_p5 }
 0x856   :  { %1390 = shalt.err (!%p1387_p7)
}
 0x857   :  { %s1395_s14 = smov 128   ;;  %s1396_s15 = smov 8  }
 0x858   :  { %1018 = dma.vmem_to_hbm [thread:$0]  %s1013_s6, 256, %s1669_s4, [#allocation3], %s1395_s14, %s1395_s14, %s1396_s15  }
 0x859   :  { %1391 = dma.done.wait [#allocation3], 256  }
 0x85a   :  { %1392 = vsyncadd [#allocation3], 4294967040 }
 0x85b   :  { %1022 = vsyncpa [#allocation3], 1 }

</bundles_post_ra>
